<compile_context>
chip_gen: v5e
topology: v5e:2x2
jax: 0.10.0
libtpu: 0.0.40
codegen_flags: <defaults>
</compile_context>

<pallas_src>
import functools

import numpy as np
import jax
import jax.numpy as jnp
from jax.experimental import pallas as pl
from jax.experimental.pallas import tpu as pltpu


def _round_up(x, m):
    return ((x + m - 1) // m) * m


# --------------------------- elementwise atan2 --------------------------------
_PI = np.float32(np.pi)
_PI_2 = np.float32(np.pi / 2.0)
_PI_4 = np.float32(np.pi / 4.0)
_TAN_3PI_8 = np.float32(2.414213562373095)   # tan(3*pi/8)
_TAN_PI_8 = np.float32(0.4142135623730951)   # tan(pi/8)


def _atan_f32(x):
    """Cephes-style float32 arctan using only VPU-friendly basic ops."""
    sgn = jnp.where(x < 0.0, -1.0, 1.0)
    ax = jnp.abs(x)
    big = ax > _TAN_3PI_8
    mid = ax > _TAN_PI_8
    safe_ax = jnp.maximum(ax, 1e-30)                       # guard unselected 1/ax
    xr = jnp.where(big, -1.0 / safe_ax,
                   jnp.where(mid, (ax - 1.0) / (ax + 1.0), ax))
    offs = jnp.where(big, _PI_2, jnp.where(mid, _PI_4, 0.0))
    z = xr * xr
    p = ((8.05374449538e-2 * z - 1.38776856032e-1) * z
         + 1.99777106478e-1) * z - 3.33329491539e-1
    return sgn * (offs + xr + xr * z * p)


def _atan2_f32(y, x):
    """torch.angle / np.arctan2 semantics (atan2(0, 0) == 0), vectorized."""
    x_is_zero = x == 0.0
    safe_x = jnp.where(x_is_zero, 1.0, x)
    base = _atan_f32(y / safe_x)
    res = jnp.where(x < 0.0,
                    jnp.where(y < 0.0, base - _PI, base + _PI),
                    base)
    res = jnp.where(x_is_zero,
                    jnp.where(y > 0.0, _PI_2,
                              jnp.where(y < 0.0, -_PI_2, 0.0)),
                    res)
    return res


# ----------------------------- Pallas kernel --------------------------------
def _stft_kernel(frames_ref, w_ref, mag_ref, phase_ref, *, n_freq, f_pad):
    # frames_ref : (1, L, TILE_T)  one batch element's frames, samples x frames
    # w_ref      : (2*f_pad, L)    rows [0:F)           = window[l] *  cos(2*pi*l*f/L)
    #                              rows [f_pad:f_pad+F) = window[l] * -sin(2*pi*l*f/L)
    # mag_ref    : (1, F, TILE_T)
    # phase_ref  : (1, F, TILE_T)
    fr = frames_ref[0]                                                  # (L, TILE_T)
    res = jnp.dot(w_ref[...], fr, preferred_element_type=jnp.float32)   # (2*Fpad, TILE_T)
    re = res[:n_freq]                     # (F, TILE_T)   cos part
    im = res[f_pad:f_pad + n_freq]        # (F, TILE_T)   -sin part (torch.stft sign)
    mag_ref[0] = jnp.sqrt(re * re + im * im)   # torch.abs
    phase_ref[0] = _atan2_f32(im, re)          # torch.angle


# ------------------------------ wrapper --------------------------------------
class SimpleSTFTPallas:
    """JAX/Pallas equivalent of dtln.simple_stft.SimpleSTFT (transform path)."""

    def __init__(self, frame_len=64, frame_hop=16, window="hann"):
        assert frame_len % frame_hop == 0
        self.eps = float(np.finfo(np.float32).eps)
        self.frame_len = frame_len
        self.frame_hop = frame_hop

        # scipy.signal.get_window('hann', N) == periodic Hann.
        # TODO(synk): only 'hann'/'none' windows built in-script (no scipy dep).
        if window == "none":
            win = jnp.ones((frame_len,), jnp.float32)
        else:
            n = jnp.arange(frame_len, dtype=jnp.float32)
            win = 0.5 - 0.5 * jnp.cos(2.0 * jnp.pi * n / frame_len)
        self.window = win.astype(jnp.float32)

        # Fused, windowed rDFT weight:  (2*Fpad, L), split point Fpad is
        # sublane-aligned (multiple of 8) so the re/im slices need no relayout.
        F = frame_len // 2 + 1
        Fpad = _round_up(F, 8)
        ll = jnp.arange(frame_len, dtype=jnp.float32)[None, :]   # (1, L)
        ff = jnp.arange(F, dtype=jnp.float32)[:, None]           # (F, 1)
        ang = 2.0 * jnp.pi * ff * ll / frame_len                 # (F, L)
        w_cos = self.window[None, :] * jnp.cos(ang)              # (F, L)
        w_sin = -self.window[None, :] * jnp.sin(ang)             # (F, L)  torch.stft sign
        w = jnp.zeros((2 * Fpad, frame_len), jnp.float32)
        w = w.at[:F].set(w_cos)
        w = w.at[Fpad:Fpad + F].set(w_sin)
        self.w_fused = w
        self.n_freq = F
        self.f_pad = Fpad

    def get_win_sum(self):
        win_len, win_inc = self.frame_len, self.frame_hop
        win_square = self.window ** 2
        win_hop = win_len - win_inc
        win_tmp = jnp.zeros((win_len + win_hop,), jnp.float32)
        for i in range(win_len // win_inc):
            win_tmp = win_tmp.at[i * win_inc:i * win_inc + win_len].add(win_square)
        return win_tmp[win_hop:win_hop + win_inc][0]

    def transform(self, x):
        """x: [B, T'] float32  ->  (mag, phase) each [B, F, T]  (center=False)."""
        B, n_samples = x.shape
        L, hop, F, Fpad = self.frame_len, self.frame_hop, self.n_freq, self.f_pad
        assert n_samples >= L
        T = (n_samples - L) // hop + 1

        # Lane-dense tiling of the frame axis (outputs' last dim).
        tile_t = min(2048, _round_up(T, 128))
        t_pad = _round_up(T, tile_t)

        # Zero-pad the audio so padded frames exist (they produce mag=phase=0
        # and are sliced off below).
        need = (t_pad - 1) * hop + L
        xp = x.astype(jnp.float32)
        if need > n_samples:
            xp = jnp.pad(xp, ((0, 0), (0, need - n_samples)))

        # Framing in (L, T) layout: frame index on the lane axis.
        # TODO(synk): framing is a 4x blow-up of the raw audio; an in-kernel
        # hop-chunk decomposition would cut input HBM traffic further.
        idx = jnp.arange(L)[:, None] + hop * jnp.arange(t_pad)[None, :]   # (L, t_pad)
        frames = xp[:, idx]                                               # (B, L, t_pad)

        grid = (B, t_pad // tile_t)
        kernel = functools.partial(_stft_kernel, n_freq=F, f_pad=Fpad)

        mag, phase = pl.pallas_call(
            kernel,
            grid=grid,
            in_specs=[
                pl.BlockSpec((1, L, tile_t), lambda b, t: (b, 0, t)),
                pl.BlockSpec((2 * Fpad, L), lambda b, t: (0, 0)),   # resident weight
            ],
            out_specs=[
                pl.BlockSpec((1, F, tile_t), lambda b, t: (b, 0, t)),
                pl.BlockSpec((1, F, tile_t), lambda b, t: (b, 0, t)),
            ],
            out_shape=[
                jax.ShapeDtypeStruct((B, F, t_pad), jnp.float32),
                jax.ShapeDtypeStruct((B, F, t_pad), jnp.float32),
            ],
            compiler_params=pltpu.CompilerParams(
                dimension_semantics=("parallel", "parallel"),
                vmem_limit_bytes=32 * 1024 * 1024,
            ),
        )(frames, self.w_fused)

        if t_pad != T:
            mag = mag[:, :, :T]
            phase = phase[:, :, :T]
        return mag, phase

    # TODO(synk): `inverse` (torch.istft overlap-add) not implemented; the
    # module's forward() raises NotImplementedError, transform() is the hot path.


# ------------------------------- main ----------------------------------------
if __name__ == "__main__":
    frame_len, frame_hop = 64, 16
    B = 2
    n_samples = frame_len + 7 * frame_hop      # -> T = 8 frames
    key = jax.random.PRNGKey(0)
    x = jax.random.normal(key, (B, n_samples), dtype=jnp.float32)

    stft = SimpleSTFTPallas(frame_len=frame_len, frame_hop=frame_hop, window="hann")
    mag, phase = stft.transform(x)
    jax.block_until_ready((mag, phase))

    # Reference check against jnp.fft.rfft on the same framed/windowed signal.
    T = (n_samples - frame_len) // frame_hop + 1
    idx = jnp.arange(T)[:, None] * frame_hop + jnp.arange(frame_len)[None, :]
    frames_ref = x[:, idx] * stft.window[None, None, :]           # (B, T, L)
    spec = jnp.fft.rfft(frames_ref, axis=-1)                      # (B, T, F)
    mag_ref = jnp.transpose(jnp.abs(spec), (0, 2, 1))
    re_ref = jnp.transpose(jnp.real(spec), (0, 2, 1))
    im_ref = jnp.transpose(jnp.imag(spec), (0, 2, 1))

    assert mag.shape == (B, frame_len // 2 + 1, T)
    assert phase.shape == (B, frame_len // 2 + 1, T)
    # Tolerances allow for MXU matmul precision of the f32 DFT while still
    # catching any layout / sign / window bug (those are O(1) errors).
    np.testing.assert_allclose(np.asarray(mag), np.asarray(mag_ref),
                               rtol=2e-2, atol=2e-2)
    np.testing.assert_allclose(np.asarray(mag * jnp.cos(phase)), np.asarray(re_ref),
                               rtol=2e-2, atol=2e-2)
    np.testing.assert_allclose(np.asarray(mag * jnp.sin(phase)), np.asarray(im_ref),
                               rtol=2e-2, atol=2e-2)

    print("KERNEL_OK")
</pallas_src>

<mosaic_0001>
module attributes {stable_mosaic.version = 11 : i64} {
  func.func @_stft_kernel(%arg0: i32, %arg1: i32, %arg2: memref<1x64x128xf32, #tpu.memory_space<vmem>>, %arg3: memref<80x64xf32, #tpu.memory_space<vmem>>, %arg4: memref<1x33x128xf32, #tpu.memory_space<vmem>>, %arg5: memref<1x33x128xf32, #tpu.memory_space<vmem>>) attributes {dimension_semantics = [#tpu.dimension_semantics<parallel>, #tpu.dimension_semantics<parallel>], iteration_bounds = array<i64: 2, 1>, scalar_prefetch = 0 : i64, scratch_operands = 0 : i64, tpu.core_type = #tpu.core_type<tc>, window_params = [{transform_indices = @transform_0, window_bounds = array<i64: 1, 64, 128>}, {pipeline_mode = #tpu.pipeline_mode<synchronous>, transform_indices = @transform_1, window_bounds = array<i64: 80, 64>}, {transform_indices = @transform_2, window_bounds = array<i64: 1, 33, 128>}, {transform_indices = @transform_3, window_bounds = array<i64: 1, 33, 128>}]} {
    %c0 = arith.constant 0 : index
    %c0_0 = arith.constant 0 : index
    %c0_1 = arith.constant 0 : index
    %0 = vector.load %arg2[%c0, %c0_0, %c0_1] : memref<1x64x128xf32, #tpu.memory_space<vmem>>, vector<1x64x128xf32>
    %1 = vector.shape_cast %0 : vector<1x64x128xf32> to vector<64x128xf32>
    %c0_2 = arith.constant 0 : index
    %c0_3 = arith.constant 0 : index
    %2 = vector.load %arg3[%c0_2, %c0_3] : memref<80x64xf32, #tpu.memory_space<vmem>>, vector<80x64xf32>
    %cst = arith.constant dense<0.000000e+00> : vector<80x128xf32>
    %3 = tpu.matmul %2, %1, %cst {dimension_numbers = #tpu.dot_dimension_numbers<[1], [0], [0], [1], [0, 0, 1, 1], [], []>} : vector<80x64xf32>, vector<64x128xf32>, vector<80x128xf32> -> vector<80x128xf32>
    %4 = vector.extract_strided_slice %3 {offsets = [0, 0], sizes = [33, 128], strides = [1, 1]} : vector<80x128xf32> to vector<33x128xf32>
    %5 = vector.extract_strided_slice %3 {offsets = [40, 0], sizes = [33, 128], strides = [1, 1]} : vector<80x128xf32> to vector<33x128xf32>
    %6 = arith.mulf %4, %4 : vector<33x128xf32>
    %7 = arith.mulf %5, %5 : vector<33x128xf32>
    %8 = arith.addf %6, %7 : vector<33x128xf32>
    %9 = math.sqrt %8 : vector<33x128xf32>
    %c0_4 = arith.constant 0 : index
    %c0_5 = arith.constant 0 : index
    %c0_6 = arith.constant 0 : index
    %10 = vector.load %arg4[%c0_4, %c0_5, %c0_6] : memref<1x33x128xf32, #tpu.memory_space<vmem>>, vector<1x33x128xf32>
    %11 = vector.shape_cast %10 : vector<1x33x128xf32> to vector<33x128xf32>
    %12 = vector.shape_cast %9 : vector<33x128xf32> to vector<1x33x128xf32>
    tpu.vector_store %arg4[%c0_4, %c0_5, %c0_6], %12 {strides = array<i32>} : memref<1x33x128xf32, #tpu.memory_space<vmem>>, vector<1x33x128xf32>,
    %cst_7 = arith.constant 0.000000e+00 : f32
    %13 = vector.broadcast %cst_7 : f32 to vector<33x128xf32>
    %14 = arith.cmpf oeq, %4, %13 : vector<33x128xf32>
    %cst_8 = arith.constant 1.000000e+00 : f32
    %15 = vector.broadcast %cst_8 : f32 to vector<33x128xf32>
    %16 = arith.select %14, %15, %4 : vector<33x128xi1>, vector<33x128xf32>
    %17 = arith.divf %5, %16 : vector<33x128xf32>
    %cst_9 = arith.constant 0.000000e+00 : f32
    %18 = vector.broadcast %cst_9 : f32 to vector<33x128xf32>
    %19 = arith.cmpf olt, %17, %18 : vector<33x128xf32>
    %cst_10 = arith.constant -1.000000e+00 : f32
    %cst_11 = arith.constant 1.000000e+00 : f32
    %20 = vector.broadcast %cst_10 : f32 to vector<33x128xf32>
    %21 = vector.broadcast %cst_11 : f32 to vector<33x128xf32>
    %22 = arith.select %19, %20, %21 : vector<33x128xi1>, vector<33x128xf32>
    %23 = math.absf %17 : vector<33x128xf32>
    %cst_12 = arith.constant 2.41421366 : f32
    %24 = vector.broadcast %cst_12 : f32 to vector<33x128xf32>
    %25 = arith.cmpf ogt, %23, %24 : vector<33x128xf32>
    %cst_13 = arith.constant 0.414213568 : f32
    %26 = vector.broadcast %cst_13 : f32 to vector<33x128xf32>
    %27 = arith.cmpf ogt, %23, %26 : vector<33x128xf32>
    %cst_14 = arith.constant 1.000000e-30 : f32
    %28 = vector.broadcast %cst_14 : f32 to vector<33x128xf32>
    %29 = arith.maximumf %23, %28 : vector<33x128xf32>
    %cst_15 = arith.constant -1.000000e+00 : f32
    %30 = vector.broadcast %cst_15 : f32 to vector<33x128xf32>
    %31 = arith.divf %30, %29 : vector<33x128xf32>
    %cst_16 = arith.constant 1.000000e+00 : f32
    %32 = vector.broadcast %cst_16 : f32 to vector<33x128xf32>
    %33 = arith.subf %23, %32 : vector<33x128xf32>
    %cst_17 = arith.constant 1.000000e+00 : f32
    %34 = vector.broadcast %cst_17 : f32 to vector<33x128xf32>
    %35 = arith.addf %23, %34 : vector<33x128xf32>
    %36 = arith.divf %33, %35 : vector<33x128xf32>
    %37 = arith.select %27, %36, %23 : vector<33x128xi1>, vector<33x128xf32>
    %38 = arith.select %25, %31, %37 : vector<33x128xi1>, vector<33x128xf32>
    %cst_18 = arith.constant 0.785398185 : f32
    %cst_19 = arith.constant 0.000000e+00 : f32
    %39 = vector.broadcast %cst_18 : f32 to vector<33x128xf32>
    %40 = vector.broadcast %cst_19 : f32 to vector<33x128xf32>
    %41 = arith.select %27, %39, %40 : vector<33x128xi1>, vector<33x128xf32>
    %cst_20 = arith.constant 1.57079637 : f32
    %42 = vector.broadcast %cst_20 : f32 to vector<33x128xf32>
    %43 = arith.select %25, %42, %41 : vector<33x128xi1>, vector<33x128xf32>
    %44 = arith.mulf %38, %38 : vector<33x128xf32>
    %cst_21 = arith.constant 0.0805374458 : f32
    %45 = vector.broadcast %cst_21 : f32 to vector<33x128xf32>
    %46 = arith.mulf %45, %44 : vector<33x128xf32>
    %cst_22 = arith.constant 0.138776854 : f32
    %47 = vector.broadcast %cst_22 : f32 to vector<33x128xf32>
    %48 = arith.subf %46, %47 : vector<33x128xf32>
    %49 = arith.mulf %48, %44 : vector<33x128xf32>
    %cst_23 = arith.constant 0.199777111 : f32
    %50 = vector.broadcast %cst_23 : f32 to vector<33x128xf32>
    %51 = arith.addf %49, %50 : vector<33x128xf32>
    %52 = arith.mulf %51, %44 : vector<33x128xf32>
    %cst_24 = arith.constant 0.333329499 : f32
    %53 = vector.broadcast %cst_24 : f32 to vector<33x128xf32>
    %54 = arith.subf %52, %53 : vector<33x128xf32>
    %55 = arith.addf %43, %38 : vector<33x128xf32>
    %56 = arith.mulf %38, %44 : vector<33x128xf32>
    %57 = arith.mulf %56, %54 : vector<33x128xf32>
    %58 = arith.addf %55, %57 : vector<33x128xf32>
    %59 = arith.mulf %22, %58 : vector<33x128xf32>
    %cst_25 = arith.constant 0.000000e+00 : f32
    %60 = vector.broadcast %cst_25 : f32 to vector<33x128xf32>
    %61 = arith.cmpf olt, %4, %60 : vector<33x128xf32>
    %cst_26 = arith.constant 0.000000e+00 : f32
    %62 = vector.broadcast %cst_26 : f32 to vector<33x128xf32>
    %63 = arith.cmpf olt, %5, %62 : vector<33x128xf32>
    %cst_27 = arith.constant 3.14159274 : f32
    %64 = vector.broadcast %cst_27 : f32 to vector<33x128xf32>
    %65 = arith.subf %59, %64 : vector<33x128xf32>
    %cst_28 = arith.constant 3.14159274 : f32
    %66 = vector.broadcast %cst_28 : f32 to vector<33x128xf32>
    %67 = arith.addf %59, %66 : vector<33x128xf32>
    %68 = arith.select %63, %65, %67 : vector<33x128xi1>, vector<33x128xf32>
    %69 = arith.select %61, %68, %59 : vector<33x128xi1>, vector<33x128xf32>
    %cst_29 = arith.constant 0.000000e+00 : f32
    %70 = vector.broadcast %cst_29 : f32 to vector<33x128xf32>
    %71 = arith.cmpf ogt, %5, %70 : vector<33x128xf32>
    %cst_30 = arith.constant 0.000000e+00 : f32
    %72 = vector.broadcast %cst_30 : f32 to vector<33x128xf32>
    %73 = arith.cmpf olt, %5, %72 : vector<33x128xf32>
    %cst_31 = arith.constant -1.57079637 : f32
    %cst_32 = arith.constant 0.000000e+00 : f32
    %74 = vector.broadcast %cst_31 : f32 to vector<33x128xf32>
    %75 = vector.broadcast %cst_32 : f32 to vector<33x128xf32>
    %76 = arith.select %73, %74, %75 : vector<33x128xi1>, vector<33x128xf32>
    %cst_33 = arith.constant 1.57079637 : f32
    %77 = vector.broadcast %cst_33 : f32 to vector<33x128xf32>
    %78 = arith.select %71, %77, %76 : vector<33x128xi1>, vector<33x128xf32>
    %79 = arith.select %14, %78, %69 : vector<33x128xi1>, vector<33x128xf32>
    %c0_34 = arith.constant 0 : index
    %c0_35 = arith.constant 0 : index
    %c0_36 = arith.constant 0 : index
    %80 = vector.load %arg5[%c0_34, %c0_35, %c0_36] : memref<1x33x128xf32, #tpu.memory_space<vmem>>, vector<1x33x128xf32>
    %81 = vector.shape_cast %80 : vector<1x33x128xf32> to vector<33x128xf32>
    %82 = vector.shape_cast %79 : vector<33x128xf32> to vector<1x33x128xf32>
    tpu.vector_store %arg5[%c0_34, %c0_35, %c0_36], %82 {strides = array<i32>} : memref<1x33x128xf32, #tpu.memory_space<vmem>>, vector<1x33x128xf32>,
    return
  }
  func.func @transform_0(%arg0: i32, %arg1: i32) -> (i32, i32, i32) {
    %c0_i32 = arith.constant 0 : i32
    %c0_i32_0 = arith.constant 0 : i32
    return %arg0, %c0_i32, %arg1 : i32, i32, i32
  }
  func.func @transform_1(%arg0: i32, %arg1: i32) -> (i32, i32) {
    %c0_i32 = arith.constant 0 : i32
    %c0_i32_0 = arith.constant 0 : i32
    %c0_i32_1 = arith.constant 0 : i32
    return %c0_i32, %c0_i32_0 : i32, i32
  }
  func.func @transform_2(%arg0: i32, %arg1: i32) -> (i32, i32, i32) {
    %c0_i32 = arith.constant 0 : i32
    %c0_i32_0 = arith.constant 0 : i32
    return %arg0, %c0_i32, %arg1 : i32, i32, i32
  }
  func.func @transform_3(%arg0: i32, %arg1: i32) -> (i32, i32, i32) {
    %c0_i32 = arith.constant 0 : i32
    %c0_i32_0 = arith.constant 0 : i32
    return %arg0, %c0_i32, %arg1 : i32, i32, i32
  }
}

</mosaic_0001>

<bundles_post_ra>
// kernel: tpu_custom_call.1
= control target key start
LH: loop header
LB: loop body
LE: loop exit
PB: predicated region body
PF: predicated region fallthrough
CT: control target
= control target key end

     0   :  { %s1118_s12 = smov 0   ;;  %s1120_s13 = smov 0   ;;  %s1692_s0 = inlined_call_operand.vmem [shape: f32[2,64,128], index: 0, kind: input, shape index: {}]   ;;  %s1693_s1 = inlined_call_operand.vmem [shape: f32[80,64], index: 1, kind: input, shape index: {}]   ;;  %s1694_s2 = inlined_call_operand.vmem [shape: f32[2,33,128], index: 2, kind: output, shape index: {0}]   ;;  %s1695_s3 = inlined_call_operand.vmem [shape: f32[2,33,128], index: 3, kind: output, shape index: {1}]  }
   0x1   :  { %s1122_s14 = smov 0  }
   0x2 LB: > { %s26_s15 = sadd.s32 1, %s1090_s13  ;;  %p943_p0 = scmp.ge.s32.totalorder %s1094_s14, 1  ;;  %s1094_s14 = sphi %s1122_s14, %s14_s14   ;;  %s1090_s13 = sphi %s1120_s13, %s1719_s13   ;;  %s1086_s12 = sphi %s1118_s12, %s1718_s12  }
   0x3   : > { %p28_p1 = scmp.ge.s32.totalorder %s26_s15, 2  ;;  %p161_p2 = scmp.lt.s32.totalorder %s1094_s14, 3 }
   0x5   : > { %s1721_s15 = smov (%p28_p1, %s26_s15), 0  ;;  %p162_p3 = pnand %p943_p0, %p161_p2 }
   0x6   : > { %p199_p4 = scmp.lt.s32.totalorder (!%p162_p3), %s1086_s12, 1 }
   0x7   : > { %165 = sbr.rel (%p162_p3) target bundleno = 304 (0x130), region = 28 }
   0xc   : > { %s1723_s12 = smov (!%p199_p4, %s1086_s12), 1  ;;  %v231_v8 = vld [vmem:[%s1693_s1] sm:$0xff]  ;;  %vm241_vm0 = vcmask 523264   ;;  %v233_v9 = vld [vmem:[%s1693_s1 + $0x10] sm:$0xff]  ;;  %v238_v11 = vld [vmem:[%s1693_s1 + $0x38] sm:$0xff]  ;;  %v1096_v63 = vmov 0.0  }
   0xd   : > { %s980_s16 = sshll.u32 %s1723_s12, 6  ;;  %v235_v10 = vld [vmem:[%s1693_s1 + $0x20] sm:$0xff]  ;;  %v232_v12 = vld [vmem:[%s1693_s1 + $0x8] sm:$0xff]  ;;  %v234_v13 = vld [vmem:[%s1693_s1 + $0x18] sm:$0xff]  ;;  %s1005_s17 = smul.u32 40, %s1723_s12 }
   0xe   : > { %s1142_s19 = scalar_lea.vmem %s1692_s0, %s980_s16  ;;  %v236_v14 = vld [vmem:[%s1693_s1 + $0x28] sm:$0xff]  ;;  %v239_v15 = vld [vmem:[%s1693_s1 + $0x40] sm:$0xff]  ;;  %v237_v16 = vld [vmem:[%s1693_s1 + $0x30] sm:$0xff] }
   0xf   : > { %v230_v0 = vld [vmem:[%s1142_s19 + $0x38] sm:$0xff]  ;;  %v229_v1 = vld [vmem:[%s1142_s19 + $0x30] sm:$0xff]  ;;  %v228_v2 = vld [vmem:[%s1142_s19 + $0x28] sm:$0xff]  ;;  %s1298_s20 = scalar_lea.vmem %s1694_s2, %s1005_s17  ;;  %s1498_s23 = scalar_lea.vmem %s1695_s3, %s1005_s17 }
  0x10   : > { %280 = vmatpush.msra.mxu0 %v230_v0  ;;  %981 = vmatpush.msra.mxu1 %v230_v0  ;;  %v227_v3 = vld [vmem:[%s1142_s19 + $0x20] sm:$0xff]  ;;  %v226_v4 = vld [vmem:[%s1142_s19 + $0x18] sm:$0xff]  ;;  %v225_v5 = vld [vmem:[%s1142_s19 + $0x10] sm:$0xff] }
  0x11   : > { %982 = vmatpush.msra.mxu2 %v230_v0  ;;  %983 = vmatpush.msra.mxu3 %v230_v0  ;;  %v224_v6 = vld [vmem:[%s1142_s19 + $0x8] sm:$0xff]  ;;  %v223_v7 = vld [vmem:[%s1142_s19] sm:$0xff] }
  0x12   : > { %281 = vmatpush.msra.mxu0 %v229_v1  ;;  %984 = vmatpush.msra.mxu1 %v229_v1  ;;  %v240_v17 = vld [vmem:[%s1693_s1 + $0x48] sm:$0xff] }
  0x13   : > { %985 = vmatpush.msra.mxu2 %v229_v1  ;;  %986 = vmatpush.msra.mxu3 %v229_v1 }
  0x14   : > { %282 = vmatpush.msra.mxu0 %v228_v2  ;;  %987 = vmatpush.msra.mxu1 %v228_v2 }
  0x15   : > { %988 = vmatpush.msra.mxu2 %v228_v2  ;;  %989 = vmatpush.msra.mxu3 %v228_v2 }
  0x16   : > { %283 = vmatpush.msra.mxu0 %v227_v3  ;;  %990 = vmatpush.msra.mxu1 %v227_v3 }
  0x17   : > { %991 = vmatpush.msra.mxu2 %v227_v3  ;;  %992 = vmatpush.msra.mxu3 %v227_v3 }
  0x18   : > { %284 = vmatpush.msra.mxu0 %v226_v4  ;;  %993 = vmatpush.msra.mxu1 %v226_v4 }
  0x19   : > { %994 = vmatpush.msra.mxu2 %v226_v4  ;;  %995 = vmatpush.msra.mxu3 %v226_v4 }
  0x1a   : > { %285 = vmatpush.msra.mxu0 %v225_v5  ;;  %996 = vmatpush.msra.mxu1 %v225_v5 }
  0x1b   : > { %997 = vmatpush.msra.mxu2 %v225_v5  ;;  %998 = vmatpush.msra.mxu3 %v225_v5 }
  0x1c   : > { %286 = vmatpush.msra.mxu0 %v224_v6  ;;  %999 = vmatpush.msra.mxu1 %v224_v6 }
  0x1d   : > { %1000 = vmatpush.msra.mxu2 %v224_v6  ;;  %1001 = vmatpush.msra.mxu3 %v224_v6 }
  0x1e   : > { %287 = vmatpush.msra.mxu0 %v223_v7  ;;  %1002 = vmatpush.msra.mxu1 %v223_v7 }
  0x1f   : > { %1003 = vmatpush.msra.mxu2 %v223_v7  ;;  %1004 = vmatpush.msra.mxu3 %v223_v7 }
  0x20   : > { %948 = vmatmul.msk.f32.vlgmr.msra.gmra.mxu0 %vm241_vm0, %v231_v8  ;;  %950 = vmatmul.msk.f32.vlgmr.msra.gmra.mxu1 %vm241_vm0, %v233_v9 }
  0x21   : > { %952 = vmatmul.msk.f32.vlgmr.msra.gmra.mxu2 %vm241_vm0, %v235_v10  ;;  %955 = vmatmul.msk.f32.vlgmr.msra.gmra.mxu3 %vm241_vm0, %v238_v11 }
  0x28   : > { %949 = vmatmul.msk.f32.gmra.mxu0 %vm241_vm0, %v232_v12  ;;  %951 = vmatmul.msk.f32.gmra.mxu1 %vm241_vm0, %v234_v13 }
  0x29   : > { %953 = vmatmul.msk.f32.gmra.mxu2 %vm241_vm0, %v236_v14  ;;  %956 = vmatmul.msk.f32.gmra.mxu3 %vm241_vm0, %v239_v15 }
  0x31   : > { %954 = vmatmul.msk.f32.gmra.mxu2 %vm241_vm0, %v237_v16  ;;  %957 = vmatmul.msk.f32.gmra.mxu3 %vm241_vm0, %v240_v17 }
  0x9d   : > { %v1192_v18 = vpop.f32.mrf.mxu0  ;;  %v1194_v19 = vpop.f32.mrf.mxu1 }
  0x9e   : > { %vm1699_vm1 = vcmp.eq.f32.partialorder %v1192_v18, 0.0  ;;  %vm401_vm2 = vcmp.eq.f32.partialorder %v1194_v19, 0.0  ;;  %v321_v24 = vmul.f32 %v1194_v19, %v1194_v19  ;;  %v319_v40 = vmul.f32 %v1192_v18, %v1192_v18 }
  0x9f   : > { %v404_v20 = vsel %vm1699_vm1, 1.0, %v1192_v18  ;;  %v406_v21 = vsel %vm401_vm2, 1.0, %v1194_v19 }
  0xa0   : > { %1032 = vrcp.f32 %v404_v20  ;;  %v450_v35 = vand.u32 2147483648, %v406_v21  ;;  %v448_v38 = vand.u32 2147483647, %v406_v21  ;;  %vm444_vm6 = vweird.f32 %v406_v21 }
  0xa1   : > { %1034 = vrcp.f32 %v406_v21  ;;  %v420_v45 = vand.u32 2147483648, %v404_v20  ;;  %vm414_vm10 = vweird.f32 %v404_v20  ;;  %v418_v53 = vand.u32 2147483647, %v404_v20 }
  0xa2   : > { %v451_v44 = vor.u32 1.1754944e-38, %v450_v35  ;;  %vm449_vm9 = vcmp.eq.f32.partialorder %v448_v38, 8.507059e+37 }
  0xa3   : > { %v421_v59 = vor.u32 1.1754944e-38, %v420_v45  ;;  %vm419_vm14 = vcmp.eq.f32.partialorder %v418_v53, 8.507059e+37 }
  0xa4   : > { %v1204_v22 = vpop.f32.mrf.mxu2  ;;  %v1206_v23 = vpop.f32.mrf.mxu3 }
  0xa5   : > { %v326_v25 = vmul.f32 %v1206_v23, %v1206_v23  ;;  %v1214_v30 = vpop.f32.mrf.mxu0  ;;  %v1217_v33 = vpop.f32.mrf.mxu1  ;;  %vm1696_vm11 = vcmp.eq.f32.partialorder %v1204_v22, 0.0  ;;  %vm761_vm13 = vcmp.lt.f32.partialorder %v1206_v23, 0.0  ;;  %vm786_vm15 = vcmp.gt.f32.partialorder %v1206_v23, 0.0 }
  0xa6   : > { %v1033_v26 = vpop.eup %1032  ;;  %vm1697_vm3 = vcmp.eq.f32.partialorder %v1214_v30, 0.0  ;;  %vm1698_vm5 = vcmp.eq.f32.partialorder %v1217_v33, 0.0  ;;  %v1251_v60 = vsel %vm1696_vm11, 1.0, %v1204_v22  ;;  %v791_v0 = vsel %vm761_vm13, -1.5707964, %v1096_v63 }
  0xa7   : > { %v1035_v27 = vpop.eup %1034  ;;  %v410_v28 = vmul.f32 %v1033_v26, %v404_v20  ;;  %v1212_v29 = vadd.f32 %v326_v25, %v321_v24  ;;  %v1228_v41 = vsel %vm1697_vm3, 1.0, %v1214_v30  ;;  %v1235_v47 = vsel %vm1698_vm5, 1.0, %v1217_v33 }
  0xa8   : > { %v440_v31 = vmul.f32 %v1035_v27, %v406_v21  ;;  %vm445_vm4 = vweird.f32 %v1035_v27  ;;  %vm415_vm8 = vweird.f32 %v1033_v26  ;;  %v1268_v5 = vmul.f32 %v1214_v30, %v1214_v30 }
  0xa9   : > { %v411_v32 = vsub.f32 1.0, %v410_v28  ;;  %1036 = vrsqrt.f32 %v1212_v29  ;;  %vm446_vm7 = vmor %vm444_vm6, %vm445_vm4  ;;  %v465_v8 = vand.u32 2147483648, %v1235_v47  ;;  %vm365_vm0 = vcmp.eq.f32.partialorder %v1212_v29, inf }
  0xaa   : > { %v441_v34 = vsub.f32 1.0, %v440_v31  ;;  %1038 = vrcp.f32 %v1228_v41  ;;  %vm416_vm12 = vmor %vm414_vm10, %vm415_vm8  ;;  %v1281_v11 = vsel %vm786_vm15, 1.5707964, %v791_v0  ;;  %vm367_vm4 = vcmp.eq.f32.partialorder %v1212_v29, 0.0 }
  0xab   : > { %v412_v36 = vmul.f32 %v1033_v26, %v411_v32  ;;  %v368_v15 = vand.u32 2147483648, %v1212_v29  ;;  %v322_v21 = vmul.f32 %v1217_v33, %v1217_v33  ;;  %v1308_v24 = vor.u32 1.1754944e-38, %v465_v8 }
  0xac   : > { %v442_v37 = vmul.f32 %v1035_v27, %v441_v34  ;;  %v1221_v39 = vpop.f32.mrf.mxu2  ;;  %v1275_v10 = vpop.f32.mrf.mxu3  ;;  %v1097_v31 = vmov 1.0  }
  0xad   : > { %v324_v42 = vmul.f32 %v1221_v39, %v1221_v39  ;;  %v413_v49 = vadd.f32 %v1033_v26, %v412_v36  ;;  %v327_v17 = vmul.f32 %v1275_v10, %v1275_v10 }
  0xae   : > { %v443_v43 = vadd.f32 %v1035_v27, %v442_v37 }
  0xaf   : > { %v1037_v46 = vpop.eup %1036  ;;  %v1237_v48 = vadd.f32 %v324_v42, %v319_v40  ;;  %v417_v56 = vsel %vm416_vm12, %v1033_v26, %v413_v49  ;;  %v1329_v42 = vadd.f32 %v327_v17, %v322_v21 }
  0xb0   : > { %v359_v50 = vmul.f32 %v1037_v46, %v1212_v29  ;;  %v447_v51 = vsel %vm446_vm7, %v1035_v27, %v443_v43  ;;  %v1253_v61 = vpop.eup %1038  ;;  %v422_v1 = vsel %vm419_vm14, %v421_v59, %v417_v56  ;;  %vm459_vm14 = vweird.f32 %v1235_v47 }
  0xb1   : > { %v452_v52 = vsel %vm449_vm9, %v451_v44, %v447_v51  ;;  %1040 = vrsqrt.f32 %v1237_v48  ;;  %v1284_v12 = vmul.f32 %v422_v1, %v1221_v39  ;;  %v1291_v14 = vmul.f32 %v1253_v61, %v1228_v41 }
  0xb2   : > { %v360_v54 = vmul.f32 %v1037_v46, %v359_v50  ;;  %v453_v55 = vmul.f32 %v452_v52, %v1206_v23  ;;  %1042 = vrcp.f32 %v1235_v47  ;;  %vm341_vm8 = vcmp.eq.f32.partialorder %v1237_v48, inf }
  0xb3   : > { %1044 = vrcp.f32 %v1251_v60  ;;  %v1313_v27 = vand.u32 2147483647, %v1284_v12  ;;  %v426_v32 = vsub.f32 1.0, %v1291_v14  ;;  %vm343_vm9 = vcmp.eq.f32.partialorder %v1237_v48, 0.0 }
  0xb4   : > { %v361_v57 = vmul.f32 0.5, %v360_v54  ;;  %v1246_v58 = vand.u32 2147483647, %v453_v55  ;;  %vm486_vm6 = vcmp.lt.f32.partialorder %v453_v55, 0.0  ;;  %v344_v35 = vand.u32 2147483648, %v1237_v48 }
  0xb5   : > { %v1327_v40 = vmax.f32 %v1313_v27, 1e-30  ;;  %v1347_v59 = vadd.f32 1.0, %v1313_v27 }
  0xb6   : > { %v362_v62 = vsub.f32 1.5, %v361_v57  ;;  %v1261_v3 = vmax.f32 %v1246_v58, 1e-30  ;;  %v1264_v4 = vadd.f32 1.0, %v1246_v58  ;;  %vm506_vm7 = vcmp.gt.f32.partialorder %v1246_v58, 0.41421357 }
  0xb7   : > { %v1041_v2 = vpop.eup %1040  ;;  %v960_v37 = vadd.f32 -1.0, %v1246_v58  ;;  %v1336_v45 = vsel %vm506_vm7, 0.7853982, %v1096_v63 }
  0xb8   : > { %v1270_v6 = vpop.eup %1042  ;;  %v363_v7 = vmul.f32 %v1037_v46, %v362_v62  ;;  %v335_v9 = vmul.f32 %v1041_v2, %v1237_v48  ;;  %1046 = vrcp.f32 %v1261_v3  ;;  %vm549_vm12 = vweird.f32 %v1261_v3 }
  0xb9   : > { %1048 = vrcp.f32 %v1264_v4  ;;  %v455_v16 = vmul.f32 %v1270_v6, %v1235_v47  ;;  %v1315_v28 = vpop.eup %1044  ;;  %vm460_vm10 = vweird.f32 %v1270_v6  ;;  %v553_v49 = vand.u32 2147483647, %v1261_v3 }
  0xba   : > { %v364_v13 = vmul.f32 %v363_v7, %v1212_v29  ;;  %v336_v25 = vmul.f32 %v1041_v2, %v335_v9  ;;  %v555_v50 = vand.u32 2147483648, %v1261_v3  ;;  %1050 = vrcp.f32 %v1327_v40  ;;  %v1358_v7 = vpop.f32.mrf.mxu2 }
  0xbb   : > { %v456_v38 = vsub.f32 1.0, %v455_v16  ;;  %v638_v53 = vand.u32 2147483647, %v1264_v4  ;;  %v640_v54 = vand.u32 2147483648, %v1264_v4  ;;  %1052 = vrsqrt.f32 %v1329_v42 }
  0xbc   : > { %v366_v20 = vsel %vm365_vm0, %v1212_v29, %v364_v13  ;;  %v1319_v29 = vsel %vm486_vm6, -1.0, %v1097_v31  ;;  %v337_v34 = vmul.f32 0.5, %v336_v25  ;;  %vm634_vm0 = vweird.f32 %v1264_v4 }
  0xbd   : > { %v369_v26 = vsel %vm367_vm4, %v368_v15, %v366_v20  ;;  %v457_v57 = vmul.f32 %v1270_v6, %v456_v38  ;;  %vm501_vm4 = vcmp.gt.f32.partialorder %v1246_v58, 2.4142137  ;;  %vm1353_vm6 = vcmp.eq.f32.partialorder %v553_v49, 8.507059e+37 }
  0xbe   : > { %396 = vst [vmem:[%s1298_s20 + $0x10] sm:$0xff] %v369_v26  ;;  %v1047_v36 = vpop.eup %1046  ;;  %v338_v46 = vsub.f32 1.5, %v337_v34  ;;  %1054 = vrcp.f32 %v1347_v59  ;;  %v556_v9 = vor.u32 1.1754944e-38, %v555_v50  ;;  %vm1360_vm3 = vcmp.eq.f32.partialorder %v638_v53, 8.507059e+37 }
  0xbf   : > { %v1049_v43 = vpop.eup %1048  ;;  %v545_v44 = vmul.f32 %v1047_v36, %v1261_v3  ;;  %vm550_vm15 = vweird.f32 %v1047_v36  ;;  %v641_v20 = vor.u32 1.1754944e-38, %v640_v54  ;;  %v458_v25 = vadd.f32 %v1270_v6, %v457_v57 }
  0xc0   : > { %v630_v51 = vmul.f32 %v1049_v43, %v1264_v4  ;;  %v339_v55 = vmul.f32 %v1041_v2, %v338_v46  ;;  %vm635_vm11 = vweird.f32 %v1049_v43  ;;  %v1051_v16 = vpop.eup %1050  ;;  %vm551_vm5 = vmor %vm549_vm12, %vm550_vm15  ;;  %v463_v38 = vand.u32 2147483647, %v1235_v47 }
  0xc1   : > { %v546_v52 = vsub.f32 1.0, %v545_v44  ;;  %vm636_vm1 = vmor %vm634_vm0, %vm635_vm11  ;;  %v515_v34 = vmul.f32 %v1051_v16, %v1327_v40  ;;  %v325_v3 = vmul.f32 %v1358_v7, %v1358_v7  ;;  %v1053_v44 = vpop.eup %1052  ;;  %v523_v53 = vand.u32 2147483647, %v1327_v40 }
  0xc2   : > { %v631_v56 = vsub.f32 1.0, %v630_v51  ;;  %v340_v0 = vmul.f32 %v339_v55, %v1237_v48  ;;  %v371_v51 = vmul.f32 %v1053_v44, %v1329_v42  ;;  %vm499_vm11 = vcmp.gt.f32.partialorder %v1313_v27, 2.4142137 }
  0xc3   : > { %v547_v62 = vmul.f32 %v1047_v36, %v546_v52  ;;  %v516_v50 = vsub.f32 1.0, %v515_v34  ;;  %v610_v13 = vand.u32 2147483648, %v1347_v59  ;;  %vm524_vm12 = vcmp.eq.f32.partialorder %v523_v53, 8.507059e+37 }
  0xc4   : > { %v632_v2 = vmul.f32 %v1049_v43, %v631_v56  ;;  %v342_v15 = vsel %vm341_vm8, %v1237_v48, %v340_v0  ;;  %vm519_vm8 = vweird.f32 %v1327_v40  ;;  %v372_v47 = vmul.f32 %v1053_v44, %v371_v51 }
  0xc5   : > { %v548_v8 = vadd.f32 %v1047_v36, %v547_v62  ;;  %v345_v21 = vsel %vm343_vm9, %v344_v35, %v342_v15  ;;  %v525_v35 = vand.u32 2147483648, %v1327_v40  ;;  %v517_v55 = vmul.f32 %v1051_v16, %v516_v50 }
  0xc6   : > { %v633_v17 = vadd.f32 %v1049_v43, %v632_v2  ;;  %394 = vst [vmem:[%s1298_s20] sm:$0xff] %v345_v21  ;;  %v608_v0 = vand.u32 2147483647, %v1347_v59  ;;  %v1415_v21 = vadd.f32 %v325_v3, %v1268_v5 }
  0xc7   : > { %v552_v26 = vsel %vm551_vm5, %v1047_v36, %v548_v8  ;;  %vm1389_vm5 = vmor %vm459_vm14, %vm460_vm10  ;;  %v526_v62 = vor.u32 1.1754944e-38, %v525_v35  ;;  %v518_v2 = vadd.f32 %v1051_v16, %v517_v55  ;;  %vm604_vm14 = vweird.f32 %v1347_v59 }
  0xc8   : > { %v557_v46 = vsel %vm1353_vm6, %v556_v9, %v552_v26  ;;  %v637_v48 = vsel %vm636_vm1, %v1049_v43, %v633_v17  ;;  %v1055_v43 = vpop.eup %1054  ;;  %vm520_vm1 = vweird.f32 %v1051_v16  ;;  %v462_v54 = vsel %vm1389_vm5, %v1270_v6, %v458_v25 }
  0xc9   : > { %v558_v36 = vmul.f32 -1.0, %v557_v46  ;;  %v642_v4 = vsel %vm1360_vm3, %v641_v20, %v637_v48  ;;  %v600_v56 = vmul.f32 %v1055_v43, %v1347_v59  ;;  %vm464_vm3 = vcmp.eq.f32.partialorder %v463_v38, 8.507059e+37  ;;  %vm521_vm9 = vmor %vm519_vm8, %vm520_vm1 }
  0xca   : > { %v643_v52 = vmul.f32 %v960_v37, %v642_v4  ;;  %v467_v37 = vsel %vm464_vm3, %v1308_v24, %v462_v54  ;;  %v373_v6 = vmul.f32 0.5, %v372_v47  ;;  %vm605_vm10 = vweird.f32 %v1055_v43 }
  0xcb   : > { %v601_v8 = vsub.f32 1.0, %v600_v56  ;;  %v1412_v15 = vmul.f32 %v467_v37, %v1275_v10  ;;  %v522_v24 = vsel %vm521_vm9, %v1051_v16, %v518_v2  ;;  %v958_v26 = vadd.f32 -1.0, %v1313_v27  ;;  %vm606_vm15 = vmor %vm604_vm14, %vm605_vm10 }
  0xcc   : > { %v676_v57 = vsel %vm506_vm7, %v643_v52, %v1246_v58  ;;  %v374_v20 = vsub.f32 1.5, %v373_v6  ;;  %vm504_vm7 = vcmp.gt.f32.partialorder %v1313_v27, 0.41421357  ;;  %v527_v40 = vsel %vm524_vm12, %v526_v62, %v522_v24 }
  0xcd   : > { %v681_v1 = vsel %vm501_vm4, %v558_v36, %v676_v57  ;;  %v602_v17 = vmul.f32 %v1055_v43, %v601_v8  ;;  %v611_v16 = vor.u32 1.1754944e-38, %v610_v13  ;;  %v1422_v48 = vand.u32 2147483647, %v1412_v15 }
  0xce   : > { %v696_v9 = vmul.f32 %v681_v1, %v681_v1  ;;  %v375_v38 = vmul.f32 %v1053_v44, %v374_v20  ;;  %1056 = vrsqrt.f32 %v1415_v21  ;;  %vm609_vm0 = vcmp.eq.f32.partialorder %v608_v0, 8.507059e+37 }
  0xcf   : > { %v603_v34 = vadd.f32 %v1055_v43, %v602_v17  ;;  %vm377_vm6 = vcmp.eq.f32.partialorder %v1329_v42, inf  ;;  %v528_v36 = vmul.f32 -1.0, %v527_v40  ;;  %v380_v44 = vand.u32 2147483648, %v1329_v42 }
  0xd0   : > { %v701_v25 = vmul.f32 0.080537446, %v696_v9  ;;  %v376_v3 = vmul.f32 %v375_v38, %v1329_v42  ;;  %vm379_vm8 = vcmp.eq.f32.partialorder %v1329_v42, 0.0  ;;  %v1431_v50 = vmax.f32 %v1422_v48, 1e-30 }
  0xd1   : > { %v607_v5 = vsel %vm606_vm15, %v1055_v43, %v603_v34  ;;  %vm429_vm5 = vweird.f32 %v1228_v41  ;;  %v684_v43 = vsel %vm504_vm7, 0.7853982, %v1096_v63  ;;  %v1438_v53 = vadd.f32 1.0, %v1422_v48 }
  0xd2   : > { %v965_v46 = vadd.f32 -0.13877685, %v701_v25  ;;  %v612_v59 = vsel %vm609_vm0, %v611_v16, %v607_v5  ;;  %v378_v49 = vsel %vm377_vm6, %v1329_v42, %v376_v3  ;;  %v691_v54 = vsel %vm501_vm4, 1.5707964, %v1336_v45 }
  0xd3   : > { %v613_v4 = vmul.f32 %v958_v26, %v612_v59  ;;  %v381_v52 = vsel %vm379_vm8, %v380_v44, %v378_v49  ;;  %v427_v42 = vmul.f32 %v1253_v61, %v426_v32  ;;  %1058 = vrcp.f32 %v1431_v50 }
  0xd4   : > { %v711_v35 = vmul.f32 %v965_v46, %v696_v9  ;;  %397 = vst [vmem:[%s1298_s20 + $0x18] sm:$0xff] %v381_v52  ;;  %v1057_v56 = vpop.eup %1056  ;;  %v570_v62 = vand.u32 2147483648, %v1431_v50  ;;  %1060 = vrcp.f32 %v1438_v53  ;;  %v731_v58 = vadd.f32 %v691_v54, %v681_v1 }
  0xd5   : > { %v674_v55 = vsel %vm504_vm7, %v613_v4, %v1313_v27  ;;  %v736_v14 = vmul.f32 %v696_v9, %v681_v1  ;;  %v689_v32 = vsel %vm499_vm11, 1.5707964, %v684_v43  ;;  %v568_v37 = vand.u32 2147483647, %v1431_v50 }
  0xd6   : > { %v716_v51 = vadd.f32 0.19977711, %v711_v35  ;;  %v679_v57 = vsel %vm499_vm11, %v528_v36, %v674_v55  ;;  %v1459_v2 = vadd.f32 -1.0, %v1422_v48  ;;  %v356_v8 = vand.u32 2147483648, %v1415_v21 }
  0xd7   : > { %v694_v45 = vmul.f32 %v679_v57, %v679_v57  ;;  %v1462_v13 = vadd.f32 %v689_v32, %v679_v57  ;;  %v571_v24 = vor.u32 1.1754944e-38, %v570_v62  ;;  %v347_v17 = vmul.f32 %v1057_v56, %v1415_v21 }
  0xd8   : > { %v721_v47 = vmul.f32 %v716_v51, %v696_v9  ;;  %vm756_vm4 = vcmp.lt.f32.partialorder %v1194_v19, 0.0  ;;  %vm564_vm1 = vweird.f32 %v1431_v50  ;;  %v653_v27 = vand.u32 2147483647, %v1438_v53 }
  0xd9   : > { %v699_v6 = vmul.f32 0.080537446, %v694_v45  ;;  %v655_v9 = vand.u32 2147483648, %v1438_v53  ;;  %v428_v20 = vadd.f32 %v1253_v61, %v427_v42  ;;  %v1059_v25 = vpop.eup %1058  ;;  %v734_v40 = vmul.f32 %v694_v45, %v679_v57 }
  0xda   : > { %v970_v0 = vadd.f32 -0.3333295, %v721_v47  ;;  %vm649_vm3 = vweird.f32 %v1438_v53  ;;  %v348_v34 = vmul.f32 %v1057_v56, %v347_v17  ;;  %vm430_vm11 = vweird.f32 %v1253_v61  ;;  %v1061_v38 = vpop.eup %1060 }
  0xdb   : > { %v963_v26 = vadd.f32 -0.13877685, %v699_v6  ;;  %v560_v16 = vmul.f32 %v1059_v25, %v1431_v50  ;;  %vm1473_vm9 = vcmp.eq.f32.partialorder %v568_v37, 8.507059e+37  ;;  %vm353_vm10 = vcmp.eq.f32.partialorder %v1415_v21, inf  ;;  %vm1485_vm15 = vmor %vm429_vm5, %vm430_vm11 }
  0xdc   : > { %v741_v1 = vmul.f32 %v970_v0, %v736_v14  ;;  %v433_v3 = vand.u32 2147483647, %v1228_v41  ;;  %v435_v35 = vand.u32 2147483648, %v1228_v41  ;;  %vm484_vm7 = vcmp.lt.f32.partialorder %v1284_v12, 0.0 }
  0xdd   : > { %v709_v36 = vmul.f32 %v963_v26, %v694_v45  ;;  %vm565_vm12 = vweird.f32 %v1059_v25  ;;  %v645_v59 = vmul.f32 %v1061_v38, %v1438_v53  ;;  %v349_v44 = vmul.f32 0.5, %v348_v34 }
  0xde   : > { %v746_v46 = vadd.f32 %v741_v1, %v731_v58  ;;  %vm355_vm14 = vcmp.eq.f32.partialorder %v1415_v21, 0.0  ;;  %v561_v51 = vsub.f32 1.0, %v560_v16  ;;  %vm650_vm0 = vweird.f32 %v1061_v38  ;;  %vm566_vm5 = vmor %vm564_vm1, %vm565_vm12 }
  0xdf   : > { %v432_v43 = vsel %vm1485_vm15, %v1253_v61, %v428_v20  ;;  %v714_v52 = vadd.f32 0.19977711, %v709_v36  ;;  %v646_v54 = vsub.f32 1.0, %v645_v59  ;;  %v350_v42 = vsub.f32 1.5, %v349_v44  ;;  %v1564_v36 = vpop.f32.mrf.mxu3 }
  0xe0   : > { %v751_v49 = vmul.f32 %v746_v46, %v1319_v29  ;;  %v436_v55 = vor.u32 1.1754944e-38, %v435_v35  ;;  %v562_v41 = vmul.f32 %v1059_v25, %v561_v51  ;;  %vm434_vm6 = vcmp.eq.f32.partialorder %v433_v3, 8.507059e+37 }
  0xe1   : > { %v719_v62 = vmul.f32 %v714_v52, %v694_v45  ;;  %v647_v58 = vmul.f32 %v1061_v38, %v646_v54  ;;  %v351_v14 = vmul.f32 %v1057_v56, %v350_v42  ;;  %vm1502_vm8 = vcmp.eq.f32.partialorder %v653_v27, 8.507059e+37 }
  0xe2   : > { %v975_v47 = vadd.f32 -3.1415927, %v751_v49  ;;  %v771_v57 = vadd.f32 3.1415927, %v751_v49  ;;  %v437_v32 = vsel %vm434_vm6, %v436_v55, %v432_v43  ;;  %v563_v29 = vadd.f32 %v1059_v25, %v562_v41 }
  0xe3   : > { %v1507_v45 = vmul.f32 %v437_v32, %v1358_v7  ;;  %v968_v37 = vadd.f32 -0.3333295, %v719_v62  ;;  %v648_v6 = vadd.f32 %v1061_v38, %v647_v58  ;;  %v352_v23 = vmul.f32 %v351_v14, %v1415_v21 }
  0xe4   : > { %v776_v61 = vsel %vm761_vm13, %v975_v47, %v771_v57  ;;  %v567_v1 = vsel %vm566_vm5, %v1059_v25, %v563_v29  ;;  %vm651_vm13 = vmor %vm649_vm3, %vm650_vm0  ;;  %v656_v27 = vor.u32 1.1754944e-38, %v655_v9  ;;  %v470_v25 = vmul.f32 %v1315_v28, %v1251_v60 }
  0xe5   : > { %v781_v56 = vsel %vm756_vm4, %v776_v61, %v751_v49  ;;  %v1522_v20 = vand.u32 2147483647, %v1507_v45  ;;  %v739_v50 = vmul.f32 %v968_v37, %v734_v40  ;;  %v572_v26 = vsel %vm1473_vm9, %v571_v24, %v567_v1 }
  0xe6   : > { %v801_v17 = vsel %vm401_vm2, %v1281_v11, %v781_v56  ;;  %v652_v34 = vsel %vm651_vm13, %v1061_v38, %v648_v6  ;;  %v354_v19 = vsel %vm353_vm10, %v1415_v21, %v352_v23  ;;  %v573_v11 = vmul.f32 -1.0, %v572_v26 }
  0xe7   : > { %806 = vst [vmem:[%s1498_s23 + $0x10] sm:$0xff] %v801_v17  ;;  %v657_v53 = vsel %vm1502_vm8, %v656_v27, %v652_v34  ;;  %v357_v9 = vsel %vm355_vm14, %v356_v8, %v354_v19  ;;  %v744_v40 = vadd.f32 %v739_v50, %v1462_v13  ;;  %vm759_vm2 = vcmp.lt.f32.partialorder %v1221_v39, 0.0 }
  0xe8   : > { %v658_v24 = vmul.f32 %v1459_v2, %v657_v53  ;;  %395 = vst [vmem:[%s1298_s20 + $0x8] sm:$0xff] %v357_v9  ;;  %v489_v38 = vsel %vm484_vm7, -1.0, %v1097_v31  ;;  %vm507_vm4 = vcmp.gt.f32.partialorder %v1422_v48, 0.41421357  ;;  %v1547_v46 = vmax.f32 %v1522_v20, 1e-30 }
  0xe9   : > { %v1550_v21 = vadd.f32 1.0, %v1522_v20  ;;  %v749_v8 = vmul.f32 %v744_v40, %v489_v38  ;;  %vm502_vm1 = vcmp.gt.f32.partialorder %v1422_v48, 2.4142137  ;;  %vm784_vm3 = vcmp.gt.f32.partialorder %v1221_v39, 0.0 }
  0xea   : > { %v677_v2 = vsel %vm507_vm4, %v658_v24, %v1422_v48  ;;  %1062 = vrcp.f32 %v1547_v46  ;;  %v789_v5 = vsel %vm759_vm2, -1.5707964, %v1096_v63  ;;  %v471_v35 = vsub.f32 1.0, %v470_v25 }
  0xeb   : > { %v682_v12 = vsel %vm502_vm1, %v573_v11, %v677_v2  ;;  %v973_v13 = vadd.f32 -3.1415927, %v749_v8  ;;  %v769_v16 = vadd.f32 3.1415927, %v749_v8  ;;  %1064 = vrcp.f32 %v1550_v21 }
  0xec   : > { %v697_v3 = vmul.f32 %v682_v12, %v682_v12  ;;  %vm754_vm11 = vcmp.lt.f32.partialorder %v1192_v18, 0.0  ;;  %v687_v44 = vsel %vm507_vm4, 0.7853982, %v1096_v63  ;;  %v794_v51 = vsel %vm784_vm3, 1.5707964, %v789_v5 }
  0xed   : > { %v774_v59 = vsel %vm759_vm2, %v973_v13, %v769_v16  ;;  %v323_v43 = vmul.f32 %v1204_v22, %v1204_v22  ;;  %vm1712_vm9 = vcmp.eq.f32.partialorder %v1192_v18, 0.0  ;;  %v328_v42 = vmul.f32 %v1564_v36, %v1564_v36 }
  0xee   : > { %v702_v4 = vmul.f32 0.080537446, %v697_v3  ;;  %v779_v49 = vsel %vm754_vm11, %v774_v59, %v749_v8  ;;  %v692_v39 = vsel %vm502_vm1, 1.5707964, %v687_v44  ;;  %vm534_vm10 = vweird.f32 %v1547_v46 }
  0xef   : > { %v799_v52 = vsel %vm1712_vm9, %v794_v51, %v779_v49  ;;  %v538_v47 = vand.u32 2147483647, %v1547_v46  ;;  %v472_v57 = vmul.f32 %v1315_v28, %v471_v35  ;;  %vm487_vm7 = vcmp.lt.f32.partialorder %v1412_v15, 0.0 }
  0xf0   : > { %v966_v54 = vadd.f32 -0.13877685, %v702_v4  ;;  %v1063_v55 = vpop.eup %1062  ;;  %804 = vst [vmem:[%s1498_s23] sm:$0xff] %v799_v52  ;;  %v1586_v62 = vadd.f32 %v328_v42, %v323_v43  ;;  %vm475_vm12 = vweird.f32 %v1315_v28  ;;  %v732_v14 = vadd.f32 %v692_v39, %v682_v12 }
  0xf1   : > { %v530_v18 = vmul.f32 %v1063_v55, %v1547_v46  ;;  %v1065_v58 = vpop.eup %1064  ;;  %vm762_vm14 = vcmp.lt.f32.partialorder %v1275_v10, 0.0  ;;  %v473_v48 = vadd.f32 %v1315_v28, %v472_v57  ;;  %vm474_vm15 = vweird.f32 %v1251_v60 }
  0xf2   : > { %v712_v41 = vmul.f32 %v966_v54, %v697_v3  ;;  %v480_v32 = vand.u32 2147483648, %v1251_v60  ;;  %v615_v0 = vmul.f32 %v1065_v58, %v1550_v21  ;;  %v478_v56 = vand.u32 2147483647, %v1251_v60  ;;  %vm1599_vm6 = vmor %vm474_vm15, %vm475_vm12 }
  0xf3   : > { %v531_v29 = vsub.f32 1.0, %v530_v18  ;;  %v737_v37 = vmul.f32 %v697_v3, %v682_v12  ;;  %vm535_vm0 = vweird.f32 %v1063_v55  ;;  %v540_v6 = vand.u32 2147483648, %v1547_v46 }
  0xf4   : > { %v717_v61 = vadd.f32 0.19977711, %v712_v41  ;;  %1066 = vrsqrt.f32 %v1586_v62  ;;  %v616_v27 = vsub.f32 1.0, %v615_v0  ;;  %v477_v50 = vsel %vm1599_vm6, %v1315_v28, %v473_v48  ;;  %vm536_vm13 = vmor %vm534_vm10, %vm535_vm0 }
  0xf5   : > { %v532_v1 = vmul.f32 %v1063_v55, %v531_v29  ;;  %vm620_vm8 = vweird.f32 %v1065_v58  ;;  %v623_v60 = vand.u32 2147483647, %v1550_v21  ;;  %v625_v26 = vand.u32 2147483648, %v1550_v21 }
  0xf6   : > { %v722_v17 = vmul.f32 %v717_v61, %v697_v3  ;;  %v481_v34 = vor.u32 1.1754944e-38, %v480_v32  ;;  %v617_v53 = vmul.f32 %v1065_v58, %v616_v27  ;;  %vm479_vm5 = vcmp.eq.f32.partialorder %v478_v56, 8.507059e+37 }
  0xf7   : > { %v533_v11 = vadd.f32 %v1063_v55, %v532_v1  ;;  %vm539_vm2 = vcmp.eq.f32.partialorder %v538_v47, 8.507059e+37  ;;  %v541_v9 = vor.u32 1.1754944e-38, %v540_v6  ;;  %vm619_vm4 = vweird.f32 %v1550_v21 }
  0xf8   : > { %v971_v19 = vadd.f32 -0.3333295, %v722_v17  ;;  %v482_v25 = vsel %vm479_vm5, %v481_v34, %v477_v50  ;;  %v618_v24 = vadd.f32 %v1065_v58, %v617_v53  ;;  %vm787_vm1 = vcmp.gt.f32.partialorder %v1275_v10, 0.0  ;;  %vm621_vm3 = vmor %vm619_vm4, %vm620_vm8 }
  0xf9   : > { %v537_v40 = vsel %vm536_vm13, %v1063_v55, %v533_v11  ;;  %v1613_v38 = vmul.f32 %v482_v25, %v1564_v36  ;;  %v959_v12 = vadd.f32 -1.0, %v1522_v20  ;;  %v626_v46 = vor.u32 1.1754944e-38, %v625_v26 }
  0xfa   : > { %v742_v28 = vmul.f32 %v971_v19, %v737_v37  ;;  %v1067_v8 = vpop.eup %1066  ;;  %v542_v2 = vsel %vm539_vm2, %v541_v9, %v537_v40  ;;  %v622_v16 = vsel %vm621_vm3, %v1065_v58, %v618_v24  ;;  %vm624_vm11 = vcmp.eq.f32.partialorder %v623_v60, 8.507059e+37 }
  0xfb   : > { %v383_v21 = vmul.f32 %v1067_v8, %v1586_v62  ;;  %v492_v5 = vsel %vm487_vm7, -1.0, %v1097_v31  ;;  %v543_v3 = vmul.f32 -1.0, %v542_v2  ;;  %v627_v35 = vsel %vm624_vm11, %v626_v46, %v622_v16 }
  0xfc   : > { %v747_v13 = vadd.f32 %v742_v28, %v732_v14  ;;  %v1623_v59 = vand.u32 2147483647, %v1613_v38  ;;  %v792_v4 = vsel %vm762_vm14, -1.5707964, %v1096_v63  ;;  %v628_v49 = vmul.f32 %v959_v12, %v627_v35 }
  0xfd   : > { %v384_v51 = vmul.f32 %v1067_v8, %v383_v21  ;;  %vm500_vm9 = vcmp.gt.f32.partialorder %v1522_v20, 2.4142137  ;;  %vm505_vm10 = vcmp.gt.f32.partialorder %v1522_v20, 0.41421357  ;;  %vm757_vm7 = vcmp.lt.f32.partialorder %v1217_v33, 0.0 }
  0xfe   : > { %v752_v44 = vmul.f32 %v747_v13, %v492_v5  ;;  %v513_v43 = vmax.f32 %v1623_v59, 1e-30  ;;  %v675_v54 = vsel %vm505_vm10, %v628_v49, %v1522_v20  ;;  %v797_v18 = vsel %vm787_vm1, 1.5707964, %v792_v4 }
  0xff   : > { %v385_v42 = vmul.f32 0.5, %v384_v51  ;;  %v680_v55 = vsel %vm500_vm9, %v543_v3, %v675_v54  ;;  %vm1715_vm12 = vcmp.eq.f32.partialorder %v1217_v33, 0.0  ;;  %v598_v32 = vadd.f32 1.0, %v1623_v59 }
 0x100   : > { %v976_v15 = vadd.f32 -3.1415927, %v752_v44  ;;  %v772_v52 = vadd.f32 3.1415927, %v752_v44  ;;  %1068 = vrcp.f32 %v513_v43  ;;  %v695_v47 = vmul.f32 %v680_v55, %v680_v55 }
 0x101   : > { %v386_v57 = vsub.f32 1.5, %v385_v42  ;;  %v392_v56 = vand.u32 2147483648, %v1586_v62  ;;  %1070 = vrcp.f32 %v598_v32  ;;  %vm391_vm15 = vcmp.eq.f32.partialorder %v1586_v62, 0.0 }
 0x102   : > { %v777_v39 = vsel %vm762_vm14, %v976_v15, %v772_v52  ;;  %v700_v14 = vmul.f32 0.080537446, %v695_v47  ;;  %vm389_vm14 = vcmp.eq.f32.partialorder %v1586_v62, inf  ;;  %v685_v1 = vsel %vm505_vm10, 0.7853982, %v1096_v63 }
 0x103   : > { %v782_v41 = vsel %vm757_vm7, %v777_v39, %v752_v44  ;;  %v387_v48 = vmul.f32 %v1067_v8, %v386_v57  ;;  %v585_v26 = vand.u32 2147483648, %v513_v43  ;;  %v735_v19 = vmul.f32 %v695_v47, %v680_v55 }
 0x104   : > { %v802_v58 = vsel %vm1715_vm12, %v797_v18, %v782_v41  ;;  %v964_v61 = vadd.f32 -0.13877685, %v700_v14  ;;  %vm579_vm6 = vweird.f32 %v513_v43  ;;  %v583_v9 = vand.u32 2147483647, %v513_v43 }
 0x105   : > { %807 = vst [vmem:[%s1498_s23 + $0x18] sm:$0xff] %v802_v58  ;;  %v388_v29 = vmul.f32 %v387_v48, %v1586_v62  ;;  %vm485_vm8 = vcmp.lt.f32.partialorder %v1507_v45, 0.0  ;;  %vm760_vm13 = vcmp.lt.f32.partialorder %v1358_v7, 0.0  ;;  %v586_v8 = vor.u32 1.1754944e-38, %v585_v26 }
 0x106   : > { %v1069_v0 = vpop.eup %1068  ;;  %v710_v10 = vmul.f32 %v964_v61, %v695_v47  ;;  %v670_v2 = vand.u32 2147483648, %v598_v32  ;;  %v668_v13 = vand.u32 2147483647, %v598_v32  ;;  %v490_v20 = vsel %vm485_vm8, -1.0, %v1097_v31 }
 0x107   : > { %v390_v37 = vsel %vm389_vm14, %v1586_v62, %v388_v29  ;;  %v575_v33 = vmul.f32 %v1069_v0, %v513_v43  ;;  %v1071_v60 = vpop.eup %1070  ;;  %vm580_vm0 = vweird.f32 %v1069_v0  ;;  %v690_v62 = vsel %vm500_vm9, 1.5707964, %v685_v1 }
 0x108   : > { %v393_v6 = vsel %vm391_vm15, %v392_v56, %v390_v37  ;;  %v715_v23 = vadd.f32 0.19977711, %v710_v10  ;;  %v660_v53 = vmul.f32 %v1071_v60, %v598_v32  ;;  %v730_v25 = vadd.f32 %v690_v62, %v680_v55  ;;  %vm581_vm5 = vmor %vm579_vm6, %vm580_vm0 }
 0x109   : > { %398 = vst [vmem:[%s1298_s20 + $0x20] sm:$0x1] %v393_v6  ;;  %v576_v17 = vsub.f32 1.0, %v575_v33  ;;  %vm665_vm2 = vweird.f32 %v1071_v60  ;;  %vm584_vm4 = vcmp.eq.f32.partialorder %v583_v9, 8.507059e+37  ;;  %vm664_vm1 = vweird.f32 %v598_v32 }
 0x10a   : > { %v720_v27 = vmul.f32 %v715_v23, %v695_v47  ;;  %v661_v40 = vsub.f32 1.0, %v660_v53  ;;  %vm785_vm3 = vcmp.gt.f32.partialorder %v1358_v7, 0.0  ;;  %v790_v45 = vsel %vm760_vm13, -1.5707964, %v1096_v63  ;;  %vm666_vm11 = vmor %vm664_vm1, %vm665_vm2 }
 0x10b   : > { %v577_v50 = vmul.f32 %v1069_v0, %v576_v17  ;;  %v962_v3 = vadd.f32 -1.0, %v1623_v59  ;;  %v671_v35 = vor.u32 1.1754944e-38, %v670_v2  ;;  %vm669_vm9 = vcmp.eq.f32.partialorder %v668_v13, 8.507059e+37 }
 0x10c   : > { %v969_v34 = vadd.f32 -0.3333295, %v720_v27  ;;  %v662_v46 = vmul.f32 %v1071_v60, %v661_v40  ;;  %vm755_vm10 = vcmp.lt.f32.partialorder %v1214_v30, 0.0  ;;  %v795_v42 = vsel %vm785_vm3, 1.5707964, %v790_v45 }
 0x10d   : > { %v578_v11 = vadd.f32 %v1069_v0, %v577_v50  ;;  %vm508_vm7 = vcmp.gt.f32.partialorder %v1623_v59, 0.41421357  ;;  %vm1716_vm12 = vcmp.eq.f32.partialorder %v1214_v30, 0.0  ;;  %vm503_vm14 = vcmp.gt.f32.partialorder %v1623_v59, 2.4142137 }
 0x10e   : > { %v740_v28 = vmul.f32 %v969_v34, %v735_v19  ;;  %v663_v5 = vadd.f32 %v1071_v60, %v662_v46  ;;  %v688_v14 = vsel %vm508_vm7, 0.7853982, %v1096_v63  ;;  %vm488_vm15 = vcmp.lt.f32.partialorder %v1613_v38, 0.0 }
 0x10f   : > { %v582_v24 = vsel %vm581_vm5, %v1069_v0, %v578_v11  ;;  %v693_v29 = vsel %vm503_vm14, 1.5707964, %v688_v14  ;;  %vm763_vm0 = vcmp.lt.f32.partialorder %v1564_v36, 0.0  ;;  %vm788_vm6 = vcmp.gt.f32.partialorder %v1564_v36, 0.0 }
 0x110   : > { %v745_v12 = vadd.f32 %v740_v28, %v730_v25  ;;  %v587_v21 = vsel %vm584_vm4, %v586_v8, %v582_v24  ;;  %v667_v49 = vsel %vm666_vm11, %v1071_v60, %v663_v5  ;;  %v793_v6 = vsel %vm763_vm0, -1.5707964, %v1096_v63 }
 0x111   : > { %v588_v51 = vmul.f32 -1.0, %v587_v21  ;;  %v672_v43 = vsel %vm669_vm9, %v671_v35, %v667_v49  ;;  %vm758_vm8 = vcmp.lt.f32.partialorder %v1204_v22, 0.0  ;;  %v798_v38 = vsel %vm788_vm6, 1.5707964, %v793_v6 }
 0x112   : > { %v750_v16 = vmul.f32 %v745_v12, %v490_v20  ;;  %v673_v52 = vmul.f32 %v962_v3, %v672_v43  ;;  %vm1717_vm5 = vcmp.eq.f32.partialorder %v1204_v22, 0.0 }
 0x114   : > { %v974_v44 = vadd.f32 -3.1415927, %v750_v16  ;;  %v770_v4 = vadd.f32 3.1415927, %v750_v16  ;;  %v678_v39 = vsel %vm508_vm7, %v673_v52, %v1623_v59  ;;  %v493_v59 = vsel %vm488_vm15, -1.0, %v1097_v31 }
 0x115   : > { %v683_v47 = vsel %vm503_vm14, %v588_v51, %v678_v39 }
 0x116   : > { %v775_v15 = vsel %vm760_vm13, %v974_v44, %v770_v4  ;;  %v698_v57 = vmul.f32 %v683_v47, %v683_v47  ;;  %v733_v30 = vadd.f32 %v693_v29, %v683_v47 }
 0x117   : > { %v780_v54 = vsel %vm755_vm10, %v775_v15, %v750_v16 }
 0x118   : > { %v800_v55 = vsel %vm1716_vm12, %v795_v42, %v780_v54  ;;  %v703_v41 = vmul.f32 0.080537446, %v698_v57  ;;  %v738_v61 = vmul.f32 %v698_v57, %v683_v47 }
 0x119   : > { %805 = vst [vmem:[%s1498_s23 + $0x8] sm:$0xff] %v800_v55 }
 0x11a   : > { %v967_v18 = vadd.f32 -0.13877685, %v703_v41 }
 0x11c   : > { %v713_v58 = vmul.f32 %v967_v18, %v698_v57 }
 0x11e   : > { %v718_v7 = vadd.f32 0.19977711, %v713_v58 }
 0x120   : > { %v723_v48 = vmul.f32 %v718_v7, %v698_v57 }
 0x122   : > { %v972_v32 = vadd.f32 -0.3333295, %v723_v48 }
 0x124   : > { %v743_v0 = vmul.f32 %v972_v32, %v738_v61 }
 0x126   : > { %v748_v56 = vadd.f32 %v743_v0, %v733_v30 }
 0x128   : > { %v753_v10 = vmul.f32 %v748_v56, %v493_v59 }
 0x12a   : > { %v977_v37 = vadd.f32 -3.1415927, %v753_v10  ;;  %v773_v33 = vadd.f32 3.1415927, %v753_v10 }
 0x12c   : > { %v778_v23 = vsel %vm763_vm0, %v977_v37, %v773_v33 }
 0x12d   : > { %v783_v17 = vsel %vm758_vm8, %v778_v23, %v753_v10 }
 0x12e   : > { %v803_v1 = vsel %vm1717_vm5, %v798_v38, %v783_v17 }
 0x12f   : > { %808 = vst [vmem:[%s1498_s23 + $0x20] sm:$0x1] %v803_v1 }
 0x130 PF: > { %s14_s14 = sadd.s32 1, %s1094_s14   ;;  %s1718_s12 = smov %s1090_s13 }
 0x131   : > { %p11_p5 = scmp.ge.s32.totalorder %s14_s14, 4   ;;  %s1719_s13 = smov %s1721_s15 }
 0x133   :  { %13 = sbr.rel (!%p11_p5) target bundleno = 2 (0x2), region = 70 }

</bundles_post_ra>
